<compile_context>
chip_gen: v7x
topology: tpu7x:2x2x1
jax: 0.10.0
libtpu: 0.0.40
codegen_flags: <defaults>
</compile_context>

<pallas_src>
import jax
import jax.numpy as jnp
from jax.experimental import pallas as pl
from jax.experimental.pallas import tpu as pltpu


def conv_layer_forward(x_nchw, w, b, gamma, beta, eps=1e-5):
    """Forward pass of ConvLayer: Conv2d(k=3,s=1,p=1) + BatchNorm2d + ReLU.

    x_nchw: (N, Cin, H, W) f32; w: (3, 3, Cin, Cout) (HWIO); b unused (exactly
    cancelled by training-mode BN mean subtraction); gamma/beta: (Cout,).
    Returns (N, Cout, H, W) f32.
    """
    del b  # conv bias is mathematically cancelled by BN mean subtraction
    N, Cin, H, W = x_nchw.shape
    KH, KW, _, Cout = w.shape
    Wp = W + 2                      # width incl. 1-pixel halo on each side
    M = H * Wp                      # flattened (padded-width) output length
    L = (H + 3) * Wp                # flattened input length (1 top + 2 bottom halo rows)
    K = KH * KW * Cin               # fused contraction length (im2col)

    # Pad once (tiny, Cin-sized), cast to bf16, flatten rows (free reshape).
    xp = jnp.pad(x_nchw.astype(jnp.bfloat16), ((0, 0), (0, 0), (1, 2), (1, 1)))
    xf = xp.reshape(N, Cin, L)

    # (Cout, 9*Cin) weight matrix, row-ordered (kh, kw, ci) to match the patch.
    wmat = jnp.transpose(w, (3, 0, 1, 2)).reshape(Cout, K).astype(jnp.bfloat16)

    # Tap offsets into the flattened padded image: tap (kh, kw) -> kh*Wp + kw.
    offsets = tuple(kh * Wp + kw for kh in range(KH) for kw in range(KW))

    # Lane-validity mask: columns with (m % Wp) < W are real pixels, the other
    # 2 per row are halo "garbage" columns excluded from the BN statistics.
    valid = ((jnp.arange(M) % Wp) < W).astype(jnp.float32).reshape(1, M)

    # ---------------- kernel 1: conv (+ fused BN statistics) ----------------
    def conv_stats_kernel(x_ref, w_ref, m_ref, o_ref, sum_ref, ssq_ref):
        @pl.when(pl.program_id(0) == 0)
        def _():
            sum_ref[...] = jnp.zeros_like(sum_ref)
            ssq_ref[...] = jnp.zeros_like(ssq_ref)

        xfl = x_ref[0]                                      # (Cin, L) bf16
        # im2col: each tap is a contiguous lane window of the flattened image.
        patches = jnp.concatenate(
            [xfl[:, o:o + M] for o in offsets], axis=0)     # (9*Cin, M) bf16
        y = jnp.dot(w_ref[...], patches,
                    preferred_element_type=jnp.float32)     # (Cout, M) f32
        o_ref[0] = y

        ym = y * m_ref[...]                                 # mask halo columns
        sum_ref[...] += jnp.sum(ym, axis=-1, keepdims=True)
        ssq_ref[...] += jnp.sum(ym * y, axis=-1, keepdims=True)

    conv_out, csum, cssq = pl.pallas_call(
        conv_stats_kernel,
        out_shape=(
            jax.ShapeDtypeStruct((N, Cout, M), jnp.float32),
            jax.ShapeDtypeStruct((Cout, 1), jnp.float32),
            jax.ShapeDtypeStruct((Cout, 1), jnp.float32),
        ),
        grid_spec=pltpu.PrefetchScalarGridSpec(
            num_scalar_prefetch=0,
            grid=(N,),
            in_specs=[
                pl.BlockSpec((1, Cin, L), lambda n: (n, 0, 0)),
                pl.BlockSpec((Cout, K), lambda n: (0, 0)),
                pl.BlockSpec((1, M), lambda n: (0, 0)),
            ],
            out_specs=(
                pl.BlockSpec((1, Cout, M), lambda n: (n, 0, 0)),
                pl.BlockSpec((Cout, 1), lambda n: (0, 0)),   # accumulated
                pl.BlockSpec((Cout, 1), lambda n: (0, 0)),   # accumulated
            ),
        ),
        # Stats outputs are accumulated across the batch axis -> "arbitrary".
        compiler_params=pltpu.CompilerParams(dimension_semantics=("arbitrary",)),
    )(xf, wmat, valid)

    # Fold BN (training-mode, biased variance, eps=1e-5) into scale/shift.
    count = jnp.float32(N * H * W)
    mean = csum[:, 0] / count
    var = cssq[:, 0] / count - mean * mean
    scale = gamma / jnp.sqrt(var + eps)
    shift = beta - mean * scale

    # --------------- kernel 2: normalize + ReLU + NCHW unpack ---------------
    def bn_relu_kernel(y_ref, sc_ref, sh_ref, o_ref):
        y = y_ref[0]                                        # (Cout, M) f32
        z = jnp.maximum(y * sc_ref[...] + sh_ref[...], 0.0)
        # Drop the 2 halo columns per row while writing the exact NCHW block.
        for h in range(H):
            o_ref[0, :, h, :] = z[:, h * Wp:h * Wp + W].astype(o_ref.dtype)

    out = pl.pallas_call(
        bn_relu_kernel,
        out_shape=jax.ShapeDtypeStruct((N, Cout, H, W), jnp.float32),
        grid_spec=pltpu.PrefetchScalarGridSpec(
            num_scalar_prefetch=0,
            grid=(N,),
            in_specs=[
                pl.BlockSpec((1, Cout, M), lambda n: (n, 0, 0)),
                pl.BlockSpec((Cout, 1), lambda n: (0, 0)),
                pl.BlockSpec((Cout, 1), lambda n: (0, 0)),
            ],
            out_specs=pl.BlockSpec((1, Cout, H, W), lambda n: (n, 0, 0, 0)),
        ),
        compiler_params=pltpu.CompilerParams(dimension_semantics=("parallel",)),
    )(conv_out, scale.reshape(Cout, 1), shift.reshape(Cout, 1))

    return out


def reference_forward(x_nchw, w, b, gamma, beta, eps=1e-5):
    """Pure-JAX f32 reference (same math as the PyTorch module)."""
    x = jnp.transpose(x_nchw, (0, 2, 3, 1)).astype(jnp.float32)
    y = jax.lax.conv_general_dilated(
        x, w.astype(jnp.float32),
        window_strides=(1, 1), padding=((1, 1), (1, 1)),
        dimension_numbers=("NHWC", "HWIO", "NHWC"),
    ) + b[None, None, None, :]
    mean = jnp.mean(y, axis=(0, 1, 2))
    var = jnp.mean((y - mean) ** 2, axis=(0, 1, 2))
    y = (y - mean) / jnp.sqrt(var + eps) * gamma + beta
    y = jnp.maximum(y, 0.0)
    return jnp.transpose(y, (0, 3, 1, 2))


if __name__ == "__main__":
    # Small shapes consistent with the module: batch=2, Cin=4, Cout=8, 16x16.
    N, Cin, Cout, H, W = 2, 4, 8, 16, 16
    key = jax.random.PRNGKey(0)
    kx, kw, kb = jax.random.split(key, 3)

    x = jax.random.normal(kx, (N, Cin, H, W), dtype=jnp.float32)
    # Deterministic synthetic parameters (shapes from nn.Conv2d / nn.BatchNorm2d).
    w = jax.random.normal(kw, (3, 3, Cin, Cout), dtype=jnp.float32) * 0.1
    b = jax.random.normal(kb, (Cout,), dtype=jnp.float32) * 0.05
    gamma = jnp.ones((Cout,), dtype=jnp.float32)   # BatchNorm2d weight default
    beta = jnp.zeros((Cout,), dtype=jnp.float32)   # BatchNorm2d bias default

    out = jax.block_until_ready(conv_layer_forward(x, w, b, gamma, beta))
    assert out.shape == (N, Cout, H, W), out.shape

    # Strict check against a reference fed the same bf16-rounded conv inputs
    # (isolates kernel math from the intentional bf16 input quantization)...
    ref_bf16_in = reference_forward(
        x.astype(jnp.bfloat16).astype(jnp.float32),
        w.astype(jnp.bfloat16).astype(jnp.float32), b, gamma, beta)
    err_tight = float(jnp.max(jnp.abs(out - ref_bf16_in)))
    assert err_tight < 2e-3, err_tight

    # ...and a looser check against the full-f32 module semantics (the gap is
    # only the bf16 rounding of the matmul inputs; accumulation stays f32).
    ref_f32 = reference_forward(x, w, b, gamma, beta)
    err_f32 = float(jnp.max(jnp.abs(out - ref_f32)))
    assert err_f32 < 2.5e-2, err_f32

    print("KERNEL_OK")
</pallas_src>

<mosaic_0001>
module attributes {stable_mosaic.version = 11 : i64} {
  func.func @conv_stats_kernel(%arg0: i32, %arg1: memref<1x4x342xbf16, #tpu.memory_space<vmem>>, %arg2: memref<8x36xbf16, #tpu.memory_space<vmem>>, %arg3: memref<1x288xf32, #tpu.memory_space<vmem>>, %arg4: memref<1x8x288xf32, #tpu.memory_space<vmem>>, %arg5: memref<8x1xf32, #tpu.memory_space<vmem>>, %arg6: memref<8x1xf32, #tpu.memory_space<vmem>>) attributes {dimension_semantics = [#tpu.dimension_semantics<arbitrary>], iteration_bounds = array<i64: 2>, scalar_prefetch = 0 : i64, scratch_operands = 0 : i64, tpu.core_type = #tpu.core_type<tc>, window_params = [{transform_indices = @transform_0, window_bounds = array<i64: 1, 4, 342>}, {pipeline_mode = #tpu.pipeline_mode<synchronous>, transform_indices = @transform_1, window_bounds = array<i64: 8, 36>}, {pipeline_mode = #tpu.pipeline_mode<synchronous>, transform_indices = @transform_2, window_bounds = array<i64: 1, 288>}, {transform_indices = @transform_3, window_bounds = array<i64: 1, 8, 288>}, {pipeline_mode = #tpu.pipeline_mode<synchronous>, transform_indices = @transform_4, window_bounds = array<i64: 8, 1>}, {pipeline_mode = #tpu.pipeline_mode<synchronous>, transform_indices = @transform_5, window_bounds = array<i64: 8, 1>}]} {
    %c0_i32 = arith.constant 0 : i32
    %0 = arith.cmpi eq, %arg0, %c0_i32 : i32
    %1 = arith.extui %0 : i1 to i32
    %c0_i32_0 = arith.constant 0 : i32
    %2 = arith.cmpi ne, %1, %c0_i32_0 : i32
    scf.if %2 {
      %cst_20 = arith.constant 0.000000e+00 : f32
      %34 = vector.broadcast %cst_20 : f32 to vector<8x1xf32>
      %c0_21 = arith.constant 0 : index
      %c0_22 = arith.constant 0 : index
      %35 = vector.load %arg5[%c0_21, %c0_22] : memref<8x1xf32, #tpu.memory_space<vmem>>, vector<8x1xf32>
      tpu.vector_store %arg5[%c0_21, %c0_22], %34 {strides = array<i32>} : memref<8x1xf32, #tpu.memory_space<vmem>>, vector<8x1xf32>,
      %cst_23 = arith.constant 0.000000e+00 : f32
      %36 = vector.broadcast %cst_23 : f32 to vector<8x1xf32>
      %c0_24 = arith.constant 0 : index
      %c0_25 = arith.constant 0 : index
      %37 = vector.load %arg6[%c0_24, %c0_25] : memref<8x1xf32, #tpu.memory_space<vmem>>, vector<8x1xf32>
      tpu.vector_store %arg6[%c0_24, %c0_25], %36 {strides = array<i32>} : memref<8x1xf32, #tpu.memory_space<vmem>>, vector<8x1xf32>,
    } else {
    }
    %c0 = arith.constant 0 : index
    %c0_1 = arith.constant 0 : index
    %c0_2 = arith.constant 0 : index
    %3 = vector.load %arg1[%c0, %c0_1, %c0_2] : memref<1x4x342xbf16, #tpu.memory_space<vmem>>, vector<1x4x342xbf16>
    %4 = vector.shape_cast %3 : vector<1x4x342xbf16> to vector<4x342xbf16>
    %5 = vector.extract_strided_slice %4 {offsets = [0, 0], sizes = [4, 288], strides = [1, 1]} : vector<4x342xbf16> to vector<4x288xbf16>
    %6 = vector.extract_strided_slice %4 {offsets = [0, 1], sizes = [4, 288], strides = [1, 1]} : vector<4x342xbf16> to vector<4x288xbf16>
    %7 = vector.extract_strided_slice %4 {offsets = [0, 2], sizes = [4, 288], strides = [1, 1]} : vector<4x342xbf16> to vector<4x288xbf16>
    %8 = vector.extract_strided_slice %4 {offsets = [0, 18], sizes = [4, 288], strides = [1, 1]} : vector<4x342xbf16> to vector<4x288xbf16>
    %9 = vector.extract_strided_slice %4 {offsets = [0, 19], sizes = [4, 288], strides = [1, 1]} : vector<4x342xbf16> to vector<4x288xbf16>
    %10 = vector.extract_strided_slice %4 {offsets = [0, 20], sizes = [4, 288], strides = [1, 1]} : vector<4x342xbf16> to vector<4x288xbf16>
    %11 = vector.extract_strided_slice %4 {offsets = [0, 36], sizes = [4, 288], strides = [1, 1]} : vector<4x342xbf16> to vector<4x288xbf16>
    %12 = vector.extract_strided_slice %4 {offsets = [0, 37], sizes = [4, 288], strides = [1, 1]} : vector<4x342xbf16> to vector<4x288xbf16>
    %13 = vector.extract_strided_slice %4 {offsets = [0, 38], sizes = [4, 288], strides = [1, 1]} : vector<4x342xbf16> to vector<4x288xbf16>
    %14 = tpu.concatenate %5, %6, %7, %8, %9, %10, %11, %12, %13 in 0 : vector<4x288xbf16>, vector<4x288xbf16>, vector<4x288xbf16>, vector<4x288xbf16>, vector<4x288xbf16>, vector<4x288xbf16>, vector<4x288xbf16>, vector<4x288xbf16>, vector<4x288xbf16> -> vector<36x288xbf16>
    %c0_3 = arith.constant 0 : index
    %c0_4 = arith.constant 0 : index
    %15 = vector.load %arg2[%c0_3, %c0_4] : memref<8x36xbf16, #tpu.memory_space<vmem>>, vector<8x36xbf16>
    %cst = arith.constant dense<0.000000e+00> : vector<8x288xf32>
    %16 = tpu.matmul %15, %14, %cst {dimension_numbers = #tpu.dot_dimension_numbers<[1], [0], [0], [1], [0, 0, 1, 1], [], []>} : vector<8x36xbf16>, vector<36x288xbf16>, vector<8x288xf32> -> vector<8x288xf32>
    %c0_5 = arith.constant 0 : index
    %c0_6 = arith.constant 0 : index
    %c0_7 = arith.constant 0 : index
    %17 = vector.load %arg4[%c0_5, %c0_6, %c0_7] : memref<1x8x288xf32, #tpu.memory_space<vmem>>, vector<1x8x288xf32>
    %18 = vector.shape_cast %17 : vector<1x8x288xf32> to vector<8x288xf32>
    %19 = vector.shape_cast %16 : vector<8x288xf32> to vector<1x8x288xf32>
    tpu.vector_store %arg4[%c0_5, %c0_6, %c0_7], %19 {strides = array<i32>} : memref<1x8x288xf32, #tpu.memory_space<vmem>>, vector<1x8x288xf32>,
    %c0_8 = arith.constant 0 : index
    %c0_9 = arith.constant 0 : index
    %20 = vector.load %arg3[%c0_8, %c0_9] : memref<1x288xf32, #tpu.memory_space<vmem>>, vector<1x288xf32>
    %21 = vector.broadcast %20 : vector<1x288xf32> to vector<8x288xf32>
    %22 = arith.mulf %16, %21 : vector<8x288xf32>
    %c0_10 = arith.constant 0 : index
    %c0_11 = arith.constant 0 : index
    %23 = vector.load %arg5[%c0_10, %c0_11] : memref<8x1xf32, #tpu.memory_space<vmem>>, vector<8x1xf32>
    %cst_12 = arith.constant dense<0.000000e+00> : vector<8xf32>
    %24 = vector.multi_reduction <add>, %22, %cst_12 [1] : vector<8x288xf32> to vector<8xf32>
    %25 = vector.shape_cast %24 : vector<8xf32> to vector<8x1xf32>
    %26 = arith.addf %23, %25 : vector<8x1xf32>
    %c0_13 = arith.constant 0 : index
    %c0_14 = arith.constant 0 : index
    %27 = vector.load %arg5[%c0_13, %c0_14] : memref<8x1xf32, #tpu.memory_space<vmem>>, vector<8x1xf32>
    tpu.vector_store %arg5[%c0_13, %c0_14], %26 {strides = array<i32>} : memref<8x1xf32, #tpu.memory_space<vmem>>, vector<8x1xf32>,
    %c0_15 = arith.constant 0 : index
    %c0_16 = arith.constant 0 : index
    %28 = vector.load %arg6[%c0_15, %c0_16] : memref<8x1xf32, #tpu.memory_space<vmem>>, vector<8x1xf32>
    %29 = arith.mulf %22, %16 : vector<8x288xf32>
    %cst_17 = arith.constant dense<0.000000e+00> : vector<8xf32>
    %30 = vector.multi_reduction <add>, %29, %cst_17 [1] : vector<8x288xf32> to vector<8xf32>
    %31 = vector.shape_cast %30 : vector<8xf32> to vector<8x1xf32>
    %32 = arith.addf %28, %31 : vector<8x1xf32>
    %c0_18 = arith.constant 0 : index
    %c0_19 = arith.constant 0 : index
    %33 = vector.load %arg6[%c0_18, %c0_19] : memref<8x1xf32, #tpu.memory_space<vmem>>, vector<8x1xf32>
    tpu.vector_store %arg6[%c0_18, %c0_19], %32 {strides = array<i32>} : memref<8x1xf32, #tpu.memory_space<vmem>>, vector<8x1xf32>,
    return
  }
  func.func @transform_0(%arg0: i32) -> (i32, i32, i32) {
    %c0_i32 = arith.constant 0 : i32
    %c0_i32_0 = arith.constant 0 : i32
    %c0_i32_1 = arith.constant 0 : i32
    return %arg0, %c0_i32, %c0_i32_0 : i32, i32, i32
  }
  func.func @transform_1(%arg0: i32) -> (i32, i32) {
    %c0_i32 = arith.constant 0 : i32
    %c0_i32_0 = arith.constant 0 : i32
    %c0_i32_1 = arith.constant 0 : i32
    return %c0_i32, %c0_i32_0 : i32, i32
  }
  func.func @transform_2(%arg0: i32) -> (i32, i32) {
    %c0_i32 = arith.constant 0 : i32
    %c0_i32_0 = arith.constant 0 : i32
    %c0_i32_1 = arith.constant 0 : i32
    return %c0_i32, %c0_i32_0 : i32, i32
  }
  func.func @transform_3(%arg0: i32) -> (i32, i32, i32) {
    %c0_i32 = arith.constant 0 : i32
    %c0_i32_0 = arith.constant 0 : i32
    %c0_i32_1 = arith.constant 0 : i32
    return %arg0, %c0_i32, %c0_i32_0 : i32, i32, i32
  }
  func.func @transform_4(%arg0: i32) -> (i32, i32) {
    %c0_i32 = arith.constant 0 : i32
    %c0_i32_0 = arith.constant 0 : i32
    %c0_i32_1 = arith.constant 0 : i32
    return %c0_i32, %c0_i32_0 : i32, i32
  }
  func.func @transform_5(%arg0: i32) -> (i32, i32) {
    %c0_i32 = arith.constant 0 : i32
    %c0_i32_0 = arith.constant 0 : i32
    %c0_i32_1 = arith.constant 0 : i32
    return %c0_i32, %c0_i32_0 : i32, i32
  }
}

</mosaic_0001>

<bundles_post_ra>
// kernel: tpu_custom_call.1
= control target key start
LH: loop header
LB: loop body
LE: loop exit
PB: predicated region body
PF: predicated region fallthrough
CT: control target
= control target key end

     0   :  { %11 = vsyncpa [#allocation3], 0  ;;  %s1220_s0 = inlined_call_operand.hbm [shape: bf16[2,4,342], index: 0, kind: input, shape index: {}]   ;;  %s1221_s1 = inlined_call_operand.hbm [shape: bf16[8,36], index: 1, kind: input, shape index: {}]   ;;  %s1222_s2 = inlined_call_operand.vmem [shape: f32[1,288], index: 2, kind: input, shape index: {}]   ;;  %s1223_s3 = inlined_call_operand.hbm [shape: f32[2,8,288], index: 3, kind: output, shape index: {0}]   ;;  %s1224_s4 = inlined_call_operand.vmem [shape: f32[8,1], index: 4, kind: output, shape index: {1}]   ;;  %s1225_s5 = inlined_call_operand.vmem [shape: f32[8,1], index: 5, kind: output, shape index: {2}]  }
   0x1   :  { %13 = vsyncpa [#allocation3 + $0x1], 0 }
   0x2   :  { %14 = vsyncpa [#allocation6], 0 }
   0x3   :  { %15 = vsyncpa [#allocation4], 0 }
   0x4   :  { %17 = vsyncpa [#allocation4 + $0x1], 0  ;;  %s937_s18 = smov 0   ;;  %s939_s19 = smov 0  }
   0x5   :  { %s941_s20 = smov 0   ;;  %s943_s21 = smov 0  }
   0x6 LB: > { %s958_s22 = sadd.s32 4294967295, %s889_s21   ;;  %s656_s23 = sadd.s32 4294967294, %s889_s21   ;;  %s889_s21 = sphi %s943_s21, %s1250_s21   ;;  %s885_s20 = sphi %s941_s20, %s1249_s20   ;;  %s881_s19 = sphi %s939_s19, %s1248_s19   ;;  %s877_s18 = sphi %s937_s18, %s1247_s18  }
   0x7   : > { %p43_p0 = scmp.ne.s32.totalorder %s881_s19, %s877_s18  ;;  %p1226_p1 = scmp.eq.s32.totalorder %s958_s22, 0 }
   0x8   : > { %p115_p3 = scmp.eq.s32.totalorder %s656_s23, 1  ;;  %p657_p5 = scmp.ge.s32.totalorder %s889_s21, 1 }
   0x9   : > { %p967_p4 = por %p1226_p1, %p43_p0  ;;  %p164_p7 = scmp.lt.s32.totalorder %s889_s21, 3 }
   0xa   : > { %p972_p6 = por %p115_p3, %p43_p0  ;;  %s891_s27 = smov [#allocation5]  }
   0xb   : > { %s1229_s24 = scalar_select %p967_p4, 1, 0 }
   0xc   : > { %s1230_s25 = scalar_select %p972_p6, 1, 0 }
   0xd   : > { %p978_p9 = pnand %p657_p5, %p164_p7  ;;  %s177_s28 = sshll.u32 %s891_s27, 4  ;;  %s178_s28 = int_to_ptr.vmem [resolvable:$true] %s177_s28 }
   0xe   : > { %s986_s29 = sadd.s32 1, %s889_s21   ;;  %s30_s8 = sadd.s32 1, %s885_s20 }
   0xf   : > { %s1231_s26 = scalar_select %p978_p9, 1, 0 }
  0x10   : > { %p697_p11 = pneg %p978_p9  ;;  %s27_s6 = ssub.s32 %s889_s21, %s986_s29 }
  0x11   : > { %p996_p13 = scmp.eq.s32.totalorder %s27_s6, 0  ;;  %s761_s11 = scalar_lea.hbm %s1221_s1, 64 }
  0x12   : > { %p990_p12 = pnand %p697_p11, %p1226_p1  ;;  %p762_p3 = scmp.ne.s32.totalorder %s1221_s1, %s761_s11 }
  0x13   : > { %s1233_s7 = scalar_select %p996_p13, 1, 0 }
  0x14   : > { %p763_p5 = pneg %p990_p12  ;;  %p768_p10 = scmp.lt.u32.totalorder %s761_s11, %s1221_s1 }
  0x16   : > { %p764_p7 = pnand %p763_p5, %p762_p3 }
  0x18   : > { %p765_p11 = pneg %p764_p7 }
  0x1a   : > { %p770_p8 = pnand %p768_p10, %p765_p11 }
  0x1c   : > { %773 = shalt.err (!%p770_p8)
}
  0x1d   : > { %s774_s16 = scalar_lea.vmem %s178_s28, 64  ;;  %p782_p6 = scmp.lt.s32.totalorder %s178_s28, %s178_s28 }
  0x1e   : > { %p775_p1 = scmp.ne.s32.totalorder %s178_s28, %s774_s16  ;;  %p783_p4 = scmp.lt.s32.totalorder %s774_s16, %s774_s16 }
  0x20   : > { %p777_p2 = pnand %p775_p1, %p763_p5  ;;  %p784_p9 = por %p783_p4, %p782_p6 }
  0x22   : > { %p778_p0 = pneg %p777_p2 }
  0x24   : > { %p785_p13 = pnand %p784_p9, %p778_p0 }
  0x26   : > { %788 = shalt.err (!%p785_p13)
}
  0x27   : > { %700 = dma.hbm_to_vmem [thread:$0]  (!%p990_p12), %s1221_s1, 64, %s178_s28, [#allocation6]  }
  0x28   : > { %p1234_p1 = scmp.ne.s32.totalorder %s1233_s7, 0  ;;  %p38_p2 = scmp.eq.s32.totalorder %s889_s21, 0 }
  0x29   : > { %p1235_p4 = scmp.ne.s32.totalorder %s885_s20, %s881_s19  ;;  %p1236_p6 = scmp.eq.s32.totalorder %s958_s22, 1 }
  0x2a   : > { %s1022_s27 = scalar_select %p1234_p1, %s885_s20, %s30_s8  }
  0x2b   : > { %p1030_p8 = por %p1236_p6, %p1235_p4  ;;  %p710_p9 = scmp.lt.s32.totalorder %s889_s21, 2 }
  0x2c   : > { %s191_s6 = sand.u32 1, %s885_s20   ;;  %p1238_p10 = pmov %p1235_p4 }
  0x2d   : > { %s684_s9 = smul.u32 6, %s191_s6  ;;  %s192_s14 = scalar_lea.sflag [#allocation3], %s191_s6 }
  0x2e   : > { %p39_p13 = por %p38_p2, %p1238_p10  ;;  %s685_s10 = smul.u32 96, %s889_s21 }
  0x2f   : > { %s195_s12 = scalar_lea.vmem [#allocation2], %s684_s9  ;;  %s794_s23 = scalar_lea.hbm %s1220_s0, 192 }
  0x30   : > { %p1040_p0 = pnand %p710_p9, %p39_p13  ;;  %s1047_s8 = scalar_lea.hbm %s1220_s0, %s685_s10 }
  0x31   : > { %s203_s13 = sshll.u32 %s195_s12, 4  ;;  %s789_s15 = scalar_lea.hbm %s1047_s8, 96  ;;  %s1049_s13 = int_to_ptr.vmem [resolvable:$true] %s203_s13 }
  0x32   : > { %p790_p12 = scmp.ne.s32.totalorder %s1047_s8, %s789_s15  ;;  %p791_p3 = pneg %p1040_p0 }
  0x33   : > { %p795_p11 = scmp.lt.u32.totalorder %s1047_s8, %s1220_s0  ;;  %p796_p1 = scmp.lt.u32.totalorder %s794_s23, %s789_s15 }
  0x34   : > { %p792_p5 = pnand %p791_p3, %p790_p12  ;;  %p798_p4 = scmp.lt.u32.totalorder %s789_s15, %s1047_s8 }
  0x35   : > { %p797_p2 = por %p796_p1, %p795_p11 }
  0x36   : > { %p793_p7 = pneg %p792_p5 }
  0x37   : > { %p799_p6 = por %p798_p4, %p797_p2 }
  0x39   : > { %p800_p9 = pnand %p799_p6, %p793_p7 }
  0x3b   : > { %803 = shalt.err (!%p800_p9)
}
  0x3c   : > { %s804_s6 = scalar_lea.vmem %s1049_s13, 96  ;;  %s892_s9 = smov [#allocation2]  }
  0x3d   : > { %p805_p10 = scmp.ne.s32.totalorder %s1049_s13, %s804_s6  ;;  %s809_s7 = sshll.u32 %s892_s9, 4  ;;  %s810_s7 = int_to_ptr.vmem [resolvable:$false] %s809_s7 }
  0x3e   : > { %s811_s12 = scalar_lea.vmem %s810_s7, 192  ;;  %p812_p5 = scmp.lt.s32.totalorder %s1049_s13, %s810_s7 }
  0x3f   : > { %p807_p13 = pnand %p805_p10, %p791_p3  ;;  %p813_p11 = scmp.lt.s32.totalorder %s811_s12, %s804_s6 }
  0x41   : > { %p808_p12 = pneg %p807_p13  ;;  %p814_p1 = por %p813_p11, %p812_p5 }
  0x43   : > { %p815_p2 = pnand %p814_p1, %p808_p12 }
  0x45   : > { %818 = shalt.err (!%p815_p2)
}
  0x46   : > { %704 = dma.hbm_to_vmem [thread:$0]  (!%p1040_p0), %s1047_s8, 96, %s1049_s13, %s192_s14  }
  0x47   : > { %p1240_p7 = scmp.ne.s32.totalorder %s1231_s26, 0 }
  0x48   : > { %s1079_s15 = sand.u32 (!%p1240_p7), 1, %s881_s19   ;;  %p1241_p3 = scmp.ne.s32.totalorder (!%p1240_p7), %s1229_s24, 0 }
  0x49   : > { %212 = sbr.rel (%p1240_p7) target bundleno = 632 (0x278), region = 32  ;;  %s215_s17 = scalar_lea.sflag (!%p1240_p7), [#allocation3], %s1079_s15 }
  0x4a   : > { %s686_s16 = smul.u32 (!%p1240_p7), 6, %s1079_s15 }
  0x4c   : > { %s218_s23 = scalar_lea.vmem (!%p1240_p7), [#allocation2], %s686_s16 }
  0x50   : > { %864 = dma.done.wait (%p1241_p3), %s215_s17, 96  }
  0x51   : > { %866 = vsyncadd (%p1241_p3), %s215_s17, 4294967200  ;;  %p1242_p4 = scmp.eq.s32.totalorder %s958_s22, 0 }
  0x53   : > { %868 = dma.done.wait (%p1242_p4), [#allocation6], 64   ;;  %p1243_p0 = pmov %p1242_p4 }
  0x54   : > { %s687_s26 = smul.u32 24, %s1079_s15  ;;  %p1244_p6 = scmp.ne.s32.totalorder %s958_s22, 0 }
  0x55   : > { %870 = vsyncadd (%p1243_p0), [#allocation6], 4294967232  ;;  %vm254_vm0 = vcmask (!%p1244_p6), 7168   ;;  %v893_v0 = vmov (!%p1244_p6), 0.0  }
  0x56   : > { %s1092_s11 = scalar_lea.vmem [#allocation7], %s687_s26  ;;  %253 = sbr.rel (%p1244_p6) target bundleno = 93 (0x5d), region = 44  ;;  %255 = vst.msk [vmem:[%s1224_s4] sm:$0xff] (!%p1244_p6), %vm254_vm0, %v893_v0  ;;  %256 = vst.msk [vmem:[%s1225_s5] sm:$0xff] (!%p1244_p6), %vm254_vm0, %v893_v0 }
  0x5d PF: > { %v257_v1 = vld [vmem:[%s218_s23] sm:$0x3f]  ;;  %v263_v2 = vlaneseq  ;;  %v894_v3 = vmov 1983009808   ;;  %s895_s10 = smov 127   ;;  %v896_v14 = vmov 0.0  }
  0x5e   : > { %v261_v4 = vunpack.c.l.s4 %v894_v3  ;;  %v275_v7 = vcombine.low %v257_v1, %v257_v1  ;;  %v259_v9 = vcombine.high %v257_v1, %v257_v1  ;;  %674 = vmatprep.subr.bf16.mxu1 %v896_v14  ;;  %s897_s28 = smov 126   ;;  %s898_s6 = smov 110   ;;  %vm902_vm1 = vmmov 0  }
  0x5f   : > { %v1102_v5 = vshrl.u32 %v263_v2, 7  ;;  %s899_s9 = smov 109   ;;  %s900_s7 = smov 108   ;;  %680 = vmatprep.mubr.msk.bf16.mxu1 %vm902_vm1, %v896_v14  ;;  %v903_v19 = vmov 0   ;;  %vm290_vm2 = vcmask 1039360   ;;  %vm301_vm3 = vcmask 1031168  }
  0x60   : > { %v262_v6 = vunpack.c.0.s8 %v261_v4  ;;  %s901_s12 = smov 92   ;;  %456 = vmatprep.mubr.bf16.mxu0 %v903_v19  ;;  %s904_s16 = smov 91   ;;  %vm359_vm4 = vcmask 1041408   ;;  %vm369_vm5 = vcmask 1043456   ;;  %vm311_vm6 = vcmask 900096  }
  0x61   : > { %s905_s17 = smov 90   ;;  %vm376_vm7 = vcmask 1045504   ;;  %vm329_vm8 = vcmask 883712   ;;  %vm338_vm9 = vcmask 752640   ;;  %vm320_vm10 = vcmask 891904   ;;  %s688_s8 = smul.u32 384, %s958_s22 }
  0x62   : > { %v265_v8 = vsub.s32 %v262_v6, %v1102_v5  ;;  %vm347_vm11 = vcmask 744448   ;;  %vm356_vm12 = vcmask 736256   ;;  %vm411_vm13 = vcmask 293888   ;;  %v509_v19 = vld [vmem:[%s1222_s2] sm:$0x7]  ;;  %s564_s13 = sshll.u32 %s1092_s11, 4  ;;  %s565_s13 = int_to_ptr.vmem [resolvable:$true] %s564_s13 }
  0x63   : > { %vm507_vm14 = vcmask 261120  }
  0x64   : > { %v282_v10 = vrot.slane %v275_v7, %v265_v8  ;;  %v1105_v11 = vrot.slane %v257_v1, %v265_v8  ;;  %v273_v13 = vrot.slane %v259_v9, %v265_v8 }
  0x66   : > { %284 = vrot.lane.b32.xlu1 %v282_v10, %s895_s10  ;;  %288 = vrot.lane.b32.xlu0 %v1105_v11, %s895_s10  ;;  %v283_v12 = vcombine.high %v282_v10, %v282_v10  ;;  %v293_v15 = vcombine.low %v1105_v11, %v1105_v11  ;;  %v294_v16 = vcombine.low %v273_v13, %v273_v13 }
  0x67   : > { %v274_v17 = vcombine.high %v1105_v11, %v1105_v11  ;;  %v304_v18 = vcombine.low %v282_v10, %v282_v10 }
  0x6a   : > { %297 = vrot.lane.b32.xlu1 %v1105_v11, %s897_s28  ;;  %286 = vrot.lane.b32.xlu0 %v283_v12, %s895_s10  ;;  %s1170_s10 = scalar_lea.hbm %s1223_s3, %s688_s8 }
  0x6e   : > { %295 = vrot.lane.b32.xlu1 %v293_v15, %s897_s28  ;;  %299 = vrot.lane.b32.xlu0 %v294_v16, %s897_s28  ;;  %s550_s28 = scalar_lea.sflag [#allocation4], %s1079_s15 }
  0x72   : > { %309 = vrot.lane.b32.xlu1 %v293_v15, %s898_s6  ;;  %307 = vrot.lane.b32.xlu0 %v282_v10, %s898_s6 }
  0x76   : > { %316 = vrot.lane.b32.xlu1 %v274_v17, %s899_s9  ;;  %305 = vrot.lane.b32.xlu0 %v304_v18, %s898_s6  ;;  %s819_s6 = scalar_lea.vmem %s565_s13, 384 }
  0x77   : > { %p820_p9 = scmp.ne.s32.totalorder %s565_s13, %s819_s6 }
  0x79   : > { %p821_p10 = pnand %p820_p9, %p1030_p8 }
  0x7a   : > { %325 = vrot.lane.b32.xlu1 %v283_v12, %s900_s7  ;;  %318 = vrot.lane.b32.xlu0 %v273_v13, %s899_s9 }
  0x7b   : > { %p822_p13 = pneg %p821_p10 }
  0x7e   : > { %314 = vrot.lane.b32.xlu1 %v1105_v11, %s899_s9  ;;  %327 = vrot.lane.b32.xlu0 %v1105_v11, %s900_s7  ;;  %s906_s9 = smov [#allocation7]  }
  0x82   : > { %334 = vrot.lane.b32.xlu1 %v1105_v11, %s901_s12  ;;  %323 = vrot.lane.b32.xlu0 %v282_v10, %s900_s7  ;;  %s823_s7 = sshll.u32 %s906_s9, 4  ;;  %s824_s7 = int_to_ptr.vmem [resolvable:$false] %s823_s7 }
  0x83   : > { %p826_p12 = scmp.lt.s32.totalorder %s565_s13, %s824_s7 }
  0x86   : > { %332 = vrot.lane.b32.xlu1 %v293_v15, %s901_s12  ;;  %336 = vrot.lane.b32.xlu0 %v294_v16, %s901_s12  ;;  %s825_s12 = scalar_lea.vmem %s824_s7, 768 }
  0x87   : > { %p827_p5 = scmp.lt.s32.totalorder %s825_s12, %s819_s6 }
  0x89   : > { %p828_p11 = por %p827_p5, %p826_p12 }
  0x8a   : > { %345 = vrot.lane.b32.xlu1 %v293_v15, %s904_s16  ;;  %343 = vrot.lane.b32.xlu0 %v282_v10, %s904_s16 }
  0x8b   : > { %p829_p1 = pnand %p828_p11, %p822_p13 }
  0x8e   : > { %350 = vrot.lane.b32.xlu1 %v1105_v11, %s905_s17  ;;  %341 = vrot.lane.b32.xlu0 %v304_v18, %s904_s16  ;;  %v521_v18 = vsub.s32 2, %v1102_v5 }
  0x92   : > { %354 = vrot.lane.b32.xlu1 %v273_v13, %s905_s17  ;;  %352 = vrot.lane.b32.xlu0 %v274_v17, %s905_s17 }
  0xd8   : > { %v285_v20 = vpop.permute.xlu1 %284  ;;  %v289_v21 = vpop.permute.xlu0 %288 }
  0xd9   : > { %v368_v28 = vsel %vm359_vm4, %v273_v13, %v289_v21 }
  0xdc   : > { %v298_v22 = vpop.permute.xlu1 %297  ;;  %v287_v23 = vpop.permute.xlu0 %286 }
  0xdd   : > { %v292_v26 = vsel %vm290_vm2, %v287_v23, %v289_v21  ;;  %v291_v33 = vsel %vm290_vm2, %v285_v20, %v287_v23  ;;  %v513_v20 = vsub.s32 0, %v1102_v5  ;;  %v517_v21 = vsub.s32 1, %v1102_v5 }
  0xde   : > { %v365_v29 = vsel %vm359_vm4, %v274_v17, %v292_v26  ;;  %v362_v39 = vsel %vm359_vm4, %v1105_v11, %v291_v33  ;;  %v410_v17 = vld [vmem:[#allocation5] sm:$0xf] }
  0xdf   : > { %v514_v23 = vrot.slane %v509_v19, %v513_v20 }
  0xe0   : > { %v296_v24 = vpop.permute.xlu1 %295  ;;  %v300_v25 = vpop.permute.xlu0 %299 }
  0xe1   : > { %v303_v27 = vsel %vm301_vm3, %v298_v22, %v300_v25  ;;  %v375_v30 = vsel %vm369_vm5, %v368_v28, %v300_v25  ;;  %v302_v37 = vsel %vm301_vm3, %v296_v24, %v298_v22  ;;  %v522_v22 = vrot.slane %v509_v19, %v521_v18 }
  0xe2   : > { %v373_v36 = vsel %vm369_vm5, %v365_v29, %v303_v27  ;;  %v371_v43 = vsel %vm369_vm5, %v362_v39, %v302_v37  ;;  %v518_v24 = vrot.slane %v509_v19, %v517_v21 }
  0xe4   : > { %v310_v31 = vpop.permute.xlu1 %309  ;;  %v308_v32 = vpop.permute.xlu0 %307 }
  0xe5   : > { %v313_v34 = vsel %vm311_vm6, %v308_v32, %v310_v31  ;;  %v384_v35 = vsel %vm376_vm7, %v375_v30, %v310_v31 }
  0xe6   : > { %675 = vmatpush3.bf16.msra.mxu1 %v384_v35  ;;  %v381_v38 = vsel %vm376_vm7, %v373_v36, %v313_v34 }
  0xe7   : > { %424 = vmatprep.subr.bf16.mxu0 %v381_v38  ;;  %676 = vmatprep.subr.bf16.mxu1 %v896_v14 }
  0xe8   : > { %v317_v40 = vpop.permute.xlu1 %316  ;;  %v306_v41 = vpop.permute.xlu0 %305 }
  0xe9   : > { %v312_v42 = vsel %vm311_vm6, %v306_v41, %v308_v32 }
  0xea   : > { %v378_v44 = vsel %vm376_vm7, %v371_v43, %v312_v42 }
  0xeb   : > { %425 = vmatpush1.bf16.msra.mxu0 %v378_v44 }
  0xec   : > { %v326_v45 = vpop.permute.xlu1 %325  ;;  %v319_v46 = vpop.permute.xlu0 %318 }
  0xed   : > { %v322_v55 = vsel %vm320_vm10, %v317_v40, %v319_v46 }
  0xf0   : > { %v315_v47 = vpop.permute.xlu1 %314  ;;  %v328_v48 = vpop.permute.xlu0 %327 }
  0xf1   : > { %v331_v53 = vsel %vm329_vm8, %v326_v45, %v328_v48  ;;  %v394_v56 = vsel %vm359_vm4, %v319_v46, %v328_v48  ;;  %v321_v3 = vsel %vm320_vm10, %v315_v47, %v317_v40 }
  0xf2   : > { %v391_v57 = vsel %vm359_vm4, %v322_v55, %v331_v53 }
  0xf4   : > { %v335_v49 = vpop.permute.xlu1 %334  ;;  %v324_v50 = vpop.permute.xlu0 %323 }
  0xf5   : > { %v330_v61 = vsel %vm329_vm8, %v324_v50, %v326_v45 }
  0xf6   : > { %v388_v4 = vsel %vm359_vm4, %v321_v3, %v330_v61 }
  0xf8   : > { %v333_v51 = vpop.permute.xlu1 %332  ;;  %v337_v52 = vpop.permute.xlu0 %336 }
  0xf9   : > { %v340_v54 = vsel %vm338_vm9, %v335_v49, %v337_v52  ;;  %v400_v58 = vsel %vm369_vm5, %v394_v56, %v337_v52  ;;  %v339_v1 = vsel %vm338_vm9, %v333_v51, %v335_v49 }
  0xfa   : > { %v398_v0 = vsel %vm369_vm5, %v391_v57, %v340_v54  ;;  %v396_v9 = vsel %vm369_vm5, %v388_v4, %v339_v1 }
  0xfc   : > { %v346_v59 = vpop.permute.xlu1 %345  ;;  %v344_v60 = vpop.permute.xlu0 %343 }
  0xfd   : > { %v349_v62 = vsel %vm347_vm11, %v344_v60, %v346_v59  ;;  %v408_v63 = vsel %vm376_vm7, %v400_v58, %v346_v59 }
  0xfe   : > { %677 = vmatpush3.bf16.msra.mxu1 %v408_v63  ;;  %v405_v2 = vsel %vm376_vm7, %v398_v0, %v349_v62 }
  0xff   : > { %426 = vmatprep.subr.bf16.mxu0 %v405_v2  ;;  %678 = vmatprep.subr.bf16.mxu1 %v896_v14 }
 0x100   : > { %v351_v6 = vpop.permute.xlu1 %350  ;;  %v342_v7 = vpop.permute.xlu0 %341 }
 0x101   : > { %v348_v8 = vsel %vm347_vm11, %v342_v7, %v344_v60 }
 0x102   : > { %v402_v10 = vsel %vm376_vm7, %v396_v9, %v348_v8 }
 0x103   : > { %427 = vmatpush1.bf16.msra.mxu0 %v402_v10 }
 0x104   : > { %v355_v11 = vpop.permute.xlu1 %354  ;;  %v353_v12 = vpop.permute.xlu0 %352 }
 0x105   : > { %v357_v13 = vsel %vm356_vm12, %v351_v6, %v353_v12  ;;  %v358_v15 = vsel %vm356_vm12, %v353_v12, %v355_v11  ;;  %v422_v16 = vsel %vm359_vm4, %v355_v11, 0 }
 0x106   : > { %664 = vmatprep.subr.msk.bf16.mxu0 %vm359_vm4, %v358_v15  ;;  %679 = vmatpush3.bf16.msra.mxu1 %v422_v16  ;;  %v416_v14 = vsel %vm359_vm4, %v357_v13, 0 }
 0x107   : > { %429 = vmatpush1.bf16.msra.mxu0 %v416_v14 }
 0x109   : > { %681 = vmatmul.mubr.msk.bf16.vlgmr.msra.gmra.mrb[0].mxu1 %vm411_vm13, %v410_v17 }
 0x10a   : > { %665 = vmatmul.mubr.msk.bf16.vlgmr.msra.gmra.mrb[0].mxu0 %vm411_vm13, %v410_v17 }
 0x1dc   : > { %v499_v25 = vpop.f32.mrb[0].mxu1 }
 0x1dd   : > { %508 = vst.msk [vmem:[%s1092_s11 + $0x10] sm:$0xff] %vm507_vm14, %v499_v25  ;;  %v528_v26 = vmul.f32 %v522_v22, %v499_v25  ;;  %v458_v27 = vpop.f32.mrb[0].mxu0  ;;  %v682_v28 = vpop.f32.mrb[1].mxu1 }
 0x1de   : > { %505 = vst [vmem:[%s1092_s11] sm:$0xff] %v458_v27  ;;  %v526_v29 = vmul.f32 %v514_v23, %v458_v27  ;;  %v460_v30 = vpop.f32.mrb[1].mxu0  ;;  %v502_v31 = vpop.f32.mrb[2].mxu1 }
 0x1df   : > { %506 = vst [vmem:[%s1092_s11 + $0x8] sm:$0xff] %v460_v30  ;;  %v527_v32 = vmul.f32 %v518_v24, %v460_v30  ;;  %v462_v33 = vpop.f32.mrb[2].mxu0  ;;  %v683_v5 = vpop.f32.mrb[3].mxu1  ;;  %v541_v34 = vmul.f32 %v528_v26, %v499_v25  ;;  %v531_v37 = vsel %vm507_vm14, %v528_v26, 0.0 }
 0x1e0   : > { %v539_v35 = vmul.f32 %v526_v29, %v458_v27  ;;  %v463_v36 = vpop.f32.mrb[3].mxu0 }
 0x1e1   : > { %v540_v38 = vmul.f32 %v527_v32, %v460_v30  ;;  %v530_v39 = vadd.f32 %v527_v32, %v526_v29  ;;  %v543_v42 = vsel %vm507_vm14, %v541_v34, 0.0 }
 0x1e3   : > { %v532_v40 = vadd.f32 %v531_v37, %v530_v39  ;;  %v542_v41 = vadd.f32 %v540_v38, %v539_v35 }
 0x1e5   : > { %533 = vadd.xlane.f32.xlu0 %v532_v40  ;;  %v544_v43 = vadd.f32 %v543_v42, %v542_v41 }
 0x1e7   : > { %545 = vadd.xlane.f32.xlu1 %v544_v43 }
 0x1e8   : > { %832 = shalt.err (!%p829_p1)
}
 0x1e9   : > { %s833_s22 = scalar_lea.hbm %s1170_s10, 384  ;;  %s837_s16 = scalar_lea.hbm %s1223_s3, 768 }
 0x1ea   : > { %p834_p2 = scmp.ne.s32.totalorder %s1170_s10, %s833_s22  ;;  %p838_p4 = scmp.lt.u32.totalorder %s1170_s10, %s1223_s3 }
 0x1eb   : > { %p839_p0 = scmp.lt.u32.totalorder %s837_s16, %s833_s22  ;;  %p841_p9 = scmp.lt.u32.totalorder %s833_s22, %s1170_s10 }
 0x1ec   : > { %p835_p7 = pnand %p834_p2, %p1030_p8 }
 0x1ed   : > { %p840_p6 = por %p839_p0, %p838_p4 }
 0x1ee   : > { %p836_p3 = pneg %p835_p7 }
 0x1ef   : > { %p842_p10 = por %p841_p9, %p840_p6 }
 0x1f1   : > { %p843_p13 = pnand %p842_p10, %p836_p3 }
 0x1f3   : > { %846 = shalt.err (!%p843_p13)
}
 0x1f4   : > { %695 = dma.vmem_to_hbm [thread:$0]  (%p1030_p8), %s565_s13, 384, %s1170_s10, %s550_s28   ;;  %v529_v44 = vld [vmem:[%s1224_s4] sm:$0xff]  ;;  %vm536_vm15 = vcmask 7168  }
 0x1f5   : > { %v538_v46 = vld [vmem:[%s1225_s5] sm:$0xff] }
 0x272   : > { %v534_v45 = vpop.xlane.xlu0 %533 }
 0x273   : > { %v535_v47 = vadd.f32 %v534_v45, %v529_v44 }
 0x274   : > { %v546_v48 = vpop.xlane.xlu1 %545 }
 0x275   : > { %537 = vst.msk [vmem:[%s1224_s4] sm:$0xff] %vm536_vm15, %v535_v47  ;;  %v547_v49 = vadd.f32 %v546_v48, %v538_v46 }
 0x277   : > { %548 = vst.msk [vmem:[%s1225_s5] sm:$0xff] %vm536_vm15, %v547_v49 }
 0x278 PF: > { %s588_s13 = sand.u32 1, %s877_s18   ;;  %p1245_p8 = scmp.ne.s32.totalorder %s1230_s25, 0 }
 0x279   : > { %p1246_p12 = scmp.ge.s32.totalorder %s889_s21, 2  ;;  %s589_s10 = scalar_lea.sflag [#allocation4], %s588_s13 }
 0x27b   : > { %p706_p5 = pnand %p1246_p12, %p1245_p8 }
 0x27d   : > { %872 = dma.done.wait (!%p706_p5), %s589_s10, 384  }
 0x27e   : > { %874 = vsyncadd (!%p706_p5), %s589_s10, 4294966912  ;;  %p20_p11 = scmp.ge.s32.totalorder %s986_s29, 4   ;;  %s1247_s18 = smov %s881_s19 }
 0x27f   : > { %s1248_s19 = smov %s885_s20  ;;  %s1249_s20 = smov %s1022_s27 }
 0x280   : > { %s1250_s21 = smov %s986_s29  ;;  %22 = sbr.rel (!%p20_p11) target bundleno = 6 (0x6), region = 101 }
 0x287   :  { %594 = vsyncpa [#allocation3], 1 }
 0x288   :  { %596 = vsyncpa [#allocation3 + $0x1], 1 }
 0x289   :  { %597 = vsyncpa [#allocation6], 1 }
 0x28a   :  { %598 = vsyncpa [#allocation4], 1 }
 0x28b   :  { %600 = vsyncpa [#allocation4 + $0x1], 1 }

</bundles_post_ra>
